<compile_context>
chip_gen: v7x
topology: tpu7x:2x2x1
jax: 0.10.0
libtpu: 0.0.40
codegen_flags: <defaults>
</compile_context>

<pallas_src>
import functools

import jax
import jax.numpy as jnp
from jax.experimental import pallas as pl
from jax.experimental.pallas import tpu as pltpu


# ----------------------------- tuning constants -----------------------------

_MAX_DMAS = 4                       # outstanding HBM->HBM DMAs for large inputs
_MIN_BYTES_PER_DMA = 1 << 20        # don't split chunks below ~1 MiB
_VMEM_COPY_MAX_BYTES = 2 << 20      # below this, one full-array VMEM copy step
                                    # (2 MiB in + 2 MiB out << 16 MiB v5e scoped VMEM)


# ----------------------------- small-array path -----------------------------

def _vmem_copy_kernel(x_ref, o_ref):
    # Whole array fits in VMEM; single unpipelined step, pure passthrough.
    o_ref[...] = x_ref[...]


# ----------------------------- large-array path -----------------------------

def _plan_chunks(shape, itemsize):
    """Static (start, rows) slices along dim 0, or None for one whole-ref DMA.

    Splitting is only done along the leading (majorest) dimension so no HBM
    tile of the (identical) source/destination layouts is ever cut:
      * ndim >= 3: dim 0 is outside the tiled last-two dims -> any boundary.
      * ndim == 2: dim 0 is the sublane dim -> boundaries kept at multiples of
        the packed sublane tile (8 * 32-bit packing factor).
      * ndim <= 1: never split (avoid lane-dim slicing) -> single DMA.
    """
    ndim = len(shape)
    if ndim < 2:
        return None

    total = 1
    for s in shape:
        total *= s
    total_bytes = total * itemsize

    pack = max(1, 4 // itemsize)                 # f32:1, bf16:2, int8/fp8:4
    row_align = 8 * pack if ndim == 2 else 1

    by_bytes = max(1, total_bytes // _MIN_BYTES_PER_DMA)
    by_rows = max(1, shape[0] // row_align)
    n = int(min(_MAX_DMAS, by_bytes, by_rows))
    if n <= 1:
        return None

    units = shape[0] // row_align
    base, extra = divmod(units, n)
    chunks = []
    start = 0
    for c in range(n):
        rows = (base + (1 if c < extra else 0)) * row_align
        if c == n - 1:
            rows = shape[0] - start              # last chunk absorbs ragged tail rows
        if rows > 0:
            chunks.append((start, rows))
        start += rows
    return chunks if len(chunks) > 1 else None


def _dma_copy_kernel(chunks, x_hbm, o_hbm, sem):
    """Identity forward: a few large, concurrently outstanding HBM->HBM DMAs."""
    copies = []
    if chunks is None:
        copies.append(pltpu.make_async_copy(x_hbm, o_hbm, sem.at[0]))
    else:
        for c, (start, rows) in enumerate(chunks):      # static Python loop
            copies.append(
                pltpu.make_async_copy(
                    x_hbm.at[pl.ds(start, rows)],
                    o_hbm.at[pl.ds(start, rows)],
                    sem.at[c],
                )
            )
    for cp in copies:       # issue all (2-4 outstanding DMA streams)
        cp.start()
    for cp in copies:       # then drain
        cp.wait()


# ------------------------------- public entry -------------------------------

def _forward_impl(x: jax.Array) -> jax.Array:
    total = int(x.size)
    if total == 0 or x.ndim == 0:
        # No kernel work is semantically required for the identity.
        return x

    itemsize = jnp.dtype(x.dtype).itemsize
    total_bytes = total * itemsize
    cost = pl.CostEstimate(flops=0, transcendentals=0,
                           bytes_accessed=2 * total_bytes)

    if total_bytes < _VMEM_COPY_MAX_BYTES:
        # Small input: single full-array VMEM copy (handles any ragged shape;
        # block_shape == full array dims is always legal).
        return pl.pallas_call(
            _vmem_copy_kernel,
            out_shape=jax.ShapeDtypeStruct(x.shape, x.dtype),
            cost_estimate=cost,
        )(x)

    # Large input: direct HBM->HBM DMA copy, no VMEM round trip.
    chunks = _plan_chunks(x.shape, itemsize)
    n_sems = 1 if chunks is None else len(chunks)
    kernel = functools.partial(_dma_copy_kernel, chunks)

    return pl.pallas_call(
        kernel,
        out_shape=jax.ShapeDtypeStruct(x.shape, x.dtype),
        in_specs=[pl.BlockSpec(memory_space=pl.ANY)],
        out_specs=pl.BlockSpec(memory_space=pl.ANY),
        scratch_shapes=[pltpu.SemaphoreType.DMA((n_sems,))],
        cost_estimate=cost,
    )(x)


# Jit the wrapper so shape-static planning stays trace-time and the call fuses
# cleanly when embedded in larger graphs.
quantum_model_forward = jax.jit(_forward_impl)


if __name__ == "__main__":
    key = jax.random.PRNGKey(0)

    # Small NCHW-style input consistent with a model forward: [B=2, C=4, H=16, W=16]
    x = jax.random.normal(key, (2, 4, 16, 16), dtype=jnp.float32)
    y = jax.block_until_ready(quantum_model_forward(x))
    assert y.shape == x.shape and y.dtype == x.dtype, (y.shape, y.dtype)
    assert bool(jnp.array_equal(y, x)), "identity forward mismatch (f32, small)"

    # Ragged bf16 shape exercises the full-array (non-tile-aligned) copy path.
    x2 = jax.random.normal(jax.random.PRNGKey(0), (3, 5, 7), dtype=jnp.bfloat16)
    y2 = jax.block_until_ready(quantum_model_forward(x2))
    assert y2.shape == x2.shape and y2.dtype == x2.dtype
    assert bool(jnp.all(y2 == x2)), "identity forward mismatch (bf16, ragged)"

    # Larger input exercises the multi-chunk HBM->HBM DMA path (4 x ~2 MiB DMAs).
    x3 = jax.random.normal(jax.random.PRNGKey(0), (8, 512, 512), dtype=jnp.float32)
    y3 = jax.block_until_ready(quantum_model_forward(x3))
    assert y3.shape == x3.shape and y3.dtype == x3.dtype
    assert bool(jnp.array_equal(y3, x3)), "identity forward mismatch (f32, DMA path)"

    print("KERNEL_OK")
</pallas_src>

<mosaic_0001>
module attributes {stable_mosaic.version = 11 : i64} {
  func.func @_vmem_copy_kernel(%arg0: memref<2x4x16x16xf32, #tpu.memory_space<vmem>>, %arg1: memref<2x4x16x16xf32, #tpu.memory_space<vmem>>) attributes {dimension_semantics = [], scalar_prefetch = 0 : i64, scratch_operands = 0 : i64, tpu.core_type = #tpu.core_type<tc>} {
    %c0 = arith.constant 0 : index
    %c0_0 = arith.constant 0 : index
    %c0_1 = arith.constant 0 : index
    %c0_2 = arith.constant 0 : index
    %0 = vector.load %arg0[%c0, %c0_0, %c0_1, %c0_2] : memref<2x4x16x16xf32, #tpu.memory_space<vmem>>, vector<2x4x16x16xf32>
    %c0_3 = arith.constant 0 : index
    %c0_4 = arith.constant 0 : index
    %c0_5 = arith.constant 0 : index
    %c0_6 = arith.constant 0 : index
    %1 = vector.load %arg1[%c0_3, %c0_4, %c0_5, %c0_6] : memref<2x4x16x16xf32, #tpu.memory_space<vmem>>, vector<2x4x16x16xf32>
    tpu.vector_store %arg1[%c0_3, %c0_4, %c0_5, %c0_6], %0 {strides = array<i32>} : memref<2x4x16x16xf32, #tpu.memory_space<vmem>>, vector<2x4x16x16xf32>,
    return
  }
}

</mosaic_0001>

<bundles_post_ra>
// kernel: _forward_impl.1
= control target key start
LH: loop header
LB: loop body
LE: loop exit
PB: predicated region body
PF: predicated region fallthrough
CT: control target
= control target key end

     0   :  { %6 = vsyncpa [#allocation3], 0  ;;  %s185_s0 = inlined_call_operand.hbm [shape: f32[2,4,16,16], index: 0, kind: input, shape index: {}]   ;;  %s186_s1 = inlined_call_operand.hbm [shape: f32[2,4,16,16], index: 1, kind: output, shape index: {}]  }
   0x1   :  { %7 = vsyncpa [#allocation4], 0  ;;  %s125_s6 = smov [#allocation2]   ;;  %s77_s10 = scalar_lea.hbm %s185_s0, 2048 }
   0x2   :  { %s13_s7 = sshll.u32 %s125_s6, 4  ;;  %p78_p0 = scmp.ne.s32.totalorder %s185_s0, %s77_s10  ;;  %s14_s7 = int_to_ptr.vmem [resolvable:$true] %s13_s7 }
   0x3   :  { %p81_p1 = scmp.lt.u32.totalorder %s77_s10, %s185_s0 }
   0x5   :  { %p83_p2 = pnand %p81_p1, %p78_p0 }
   0x7   :  { %86 = shalt.err (!%p83_p2)
}
   0x8   :  { %s87_s15 = scalar_lea.vmem %s14_s7, 2048  ;;  %p92_p4 = scmp.lt.s32.totalorder %s14_s7, %s14_s7 }
   0x9   :  { %p88_p3 = scmp.ne.s32.totalorder %s14_s7, %s87_s15  ;;  %p93_p5 = scmp.lt.s32.totalorder %s87_s15, %s87_s15 }
   0xb   :  { %p94_p6 = por %p93_p5, %p92_p4 }
   0xd   :  { %p95_p7 = pnand %p94_p6, %p88_p3 }
   0xf   :  { %98 = shalt.err (!%p95_p7)
}
  0x10   :  { %s126_s16 = smov 128   ;;  %s127_s17 = smov 8  }
  0x11   :  { %19 = dma.hbm_to_vmem [thread:$0]  %s185_s0, 2048, %s14_s7, [#allocation3], %s126_s16, %s126_s16, %s127_s17  }
  0x12   :  { %121 = dma.done.wait [#allocation3], 2048  }
  0x13   :  { %122 = vsyncadd [#allocation3], 4294965248  ;;  %vm39_vm0 = vcmask 130048   ;;  %v23_v0 = vld [vmem:[#allocation2] sm:$0xff]  ;;  %v24_v1 = vld [vmem:[#allocation2 + $0x8] sm:$0xff]  ;;  %s128_s20 = smov [#allocation5]  }
  0x14   :  { %v25_v2 = vld [vmem:[#allocation2 + $0x10] sm:$0xff]  ;;  %40 = vst.msk [vmem:[#allocation5] sm:$0xff] %vm39_vm0, %v23_v0  ;;  %41 = vst.msk [vmem:[#allocation5 + $0x8] sm:$0xff] %vm39_vm0, %v24_v1  ;;  %v26_v3 = vld [vmem:[#allocation2 + $0x18] sm:$0xff]  ;;  %s61_s21 = sshll.u32 %s128_s20, 4  ;;  %s62_s21 = int_to_ptr.vmem [resolvable:$true] %s61_s21 }
  0x15   :  { %42 = vst.msk [vmem:[#allocation5 + $0x10] sm:$0xff] %vm39_vm0, %v25_v2  ;;  %v27_v4 = vld [vmem:[#allocation2 + $0x20] sm:$0xff]  ;;  %v28_v5 = vld [vmem:[#allocation2 + $0x28] sm:$0xff]  ;;  %43 = vst.msk [vmem:[#allocation5 + $0x18] sm:$0xff] %vm39_vm0, %v26_v3  ;;  %s99_s0 = scalar_lea.vmem %s62_s21, 2048  ;;  %p104_p9 = scmp.lt.s32.totalorder %s62_s21, %s62_s21 }
  0x16   :  { %44 = vst.msk [vmem:[#allocation5 + $0x20] sm:$0xff] %vm39_vm0, %v27_v4  ;;  %45 = vst.msk [vmem:[#allocation5 + $0x28] sm:$0xff] %vm39_vm0, %v28_v5  ;;  %v29_v6 = vld [vmem:[#allocation2 + $0x30] sm:$0xff]  ;;  %v30_v7 = vld [vmem:[#allocation2 + $0x38] sm:$0xff]  ;;  %p100_p8 = scmp.ne.s32.totalorder %s62_s21, %s99_s0  ;;  %p105_p10 = scmp.lt.s32.totalorder %s99_s0, %s99_s0 }
  0x17   :  { %v31_v8 = vld [vmem:[#allocation2 + $0x40] sm:$0xff]  ;;  %46 = vst.msk [vmem:[#allocation5 + $0x30] sm:$0xff] %vm39_vm0, %v29_v6  ;;  %47 = vst.msk [vmem:[#allocation5 + $0x38] sm:$0xff] %vm39_vm0, %v30_v7  ;;  %v32_v9 = vld [vmem:[#allocation2 + $0x48] sm:$0xff] }
  0x18   :  { %48 = vst.msk [vmem:[#allocation5 + $0x40] sm:$0xff] %vm39_vm0, %v31_v8  ;;  %v33_v10 = vld [vmem:[#allocation2 + $0x50] sm:$0xff]  ;;  %v34_v11 = vld [vmem:[#allocation2 + $0x58] sm:$0xff]  ;;  %49 = vst.msk [vmem:[#allocation5 + $0x48] sm:$0xff] %vm39_vm0, %v32_v9  ;;  %p106_p11 = por %p105_p10, %p104_p9 }
  0x19   :  { %50 = vst.msk [vmem:[#allocation5 + $0x50] sm:$0xff] %vm39_vm0, %v33_v10  ;;  %51 = vst.msk [vmem:[#allocation5 + $0x58] sm:$0xff] %vm39_vm0, %v34_v11  ;;  %v35_v12 = vld [vmem:[#allocation2 + $0x60] sm:$0xff]  ;;  %v36_v13 = vld [vmem:[#allocation2 + $0x68] sm:$0xff] }
  0x1a   :  { %v37_v14 = vld [vmem:[#allocation2 + $0x70] sm:$0xff]  ;;  %52 = vst.msk [vmem:[#allocation5 + $0x60] sm:$0xff] %vm39_vm0, %v35_v12  ;;  %53 = vst.msk [vmem:[#allocation5 + $0x68] sm:$0xff] %vm39_vm0, %v36_v13  ;;  %v38_v15 = vld [vmem:[#allocation2 + $0x78] sm:$0xff]  ;;  %p107_p12 = pnand %p106_p11, %p100_p8 }
  0x1b   :  { %54 = vst.msk [vmem:[#allocation5 + $0x70] sm:$0xff] %vm39_vm0, %v37_v14  ;;  %55 = vst.msk [vmem:[#allocation5 + $0x78] sm:$0xff] %vm39_vm0, %v38_v15 }
  0x1c   :  { %110 = shalt.err (!%p107_p12)
}
  0x1d   :  { %s111_s24 = scalar_lea.hbm %s186_s1, 2048 }
  0x1e   :  { %p112_p13 = scmp.ne.s32.totalorder %s186_s1, %s111_s24  ;;  %p115_p0 = scmp.lt.u32.totalorder %s111_s24, %s186_s1 }
  0x20   :  { %p117_p1 = pnand %p115_p0, %p112_p13 }
  0x22   :  { %120 = shalt.err (!%p117_p1)
}
  0x23   :  { %67 = dma.vmem_to_hbm [thread:$0]  %s62_s21, 2048, %s186_s1, [#allocation4], %s126_s16, %s126_s16, %s127_s17  }
  0x24   :  { %123 = dma.done.wait [#allocation4], 2048  }
  0x25   :  { %124 = vsyncadd [#allocation4], 4294965248 }
  0x26   :  { %71 = vsyncpa [#allocation3], 1 }
  0x27   :  { %72 = vsyncpa [#allocation4], 1 }

</bundles_post_ra>
